<compile_context>
chip_gen: v7x
topology: tpu7x:2x2x1
jax: 0.10.0
libtpu: 0.0.40
codegen_flags: <defaults>
</compile_context>

<pallas_src>
import jax
import jax.numpy as jnp
from jax.experimental import pallas as pl
from jax.experimental.pallas import tpu as pltpu

LANE = 128  # lane-padded width of every state / gate block


# ---------------------------------------------------------------------------
# Kernel: one grid step == one LSTMCell layer
# ---------------------------------------------------------------------------

def _lstm_layer_kernel(st_ref, w_ref, out_ref, hcar_ref):
    """One fully lane-padded LSTMCell layer per grid step.

      st_ref   : (B, 2*128) = [xh_extra | c_prev]   (this layer's block)
                   layer 0: xh_extra = [x   | h0 | 1 | 0...],  c_prev = c0 (padded)
                   layer 1: xh_extra = [0_H | h1 | 1 | 0...],  c_prev = c1 (padded)
      w_ref    : (128, 4*128) = [W_ih ; W_hh ; bias-row], gate g in lanes
                 [g*128 : g*128 + hid]; everything else zero.
      out_ref  : (B, 2*128) = [h_new | c_new]        (this layer's block)
      hcar_ref : (B, 128)   VMEM scratch carrying h between the two layers.
    """
    L = LANE
    l = pl.program_id(0)

    @pl.when(l == 0)
    def _():
        hcar_ref[...] = jnp.zeros_like(hcar_ref)

    # layer 0: 0 + [x|h0|1]        layer 1: h_lay1 + [0_H|h1|1]   (disjoint lanes)
    xh = hcar_ref[...] + st_ref[:, 0:L]
    c_prev = st_ref[:, L:2 * L]

    # single merged [x|h|1] @ [W_ih ; W_hh ; b] MXU pass (bias folded in)
    gates = jnp.dot(xh, w_ref[...], preferred_element_type=jnp.float32)

    if_g = jax.nn.sigmoid(gates[:, 0:2 * L])       # i and f in one contiguous slab
    i_g = if_g[:, 0:L]
    f_g = if_g[:, L:2 * L]
    g_g = jnp.tanh(gates[:, 2 * L:3 * L])
    o_g = jax.nn.sigmoid(gates[:, 3 * L:4 * L])

    c_new = f_g * c_prev + i_g * g_g               # padded lanes stay exactly 0
    h_new = o_g * jnp.tanh(c_new)

    hcar_ref[...] = h_new                          # carry into the next layer
    out_ref[:, 0:L] = h_new
    out_ref[:, L:2 * L] = c_new


# ---------------------------------------------------------------------------
# Parameter init / packing
# ---------------------------------------------------------------------------

def init_lstm_cell_params(key, input_size, hidden_size):
    """Deterministic init matching torch.nn.LSTMCell shapes (gate order i,f,g,o).

    Weights are stored transposed as (in_features, 4*hidden) so the cell
    computes x @ W_ih + h @ W_hh + b, with b = b_ih + b_hh.
    """
    k1, k2, k3, k4 = jax.random.split(key, 4)
    bound = float(hidden_size) ** -0.5
    w_ih = jax.random.uniform(k1, (input_size, 4 * hidden_size),
                              jnp.float32, -bound, bound)
    w_hh = jax.random.uniform(k2, (hidden_size, 4 * hidden_size),
                              jnp.float32, -bound, bound)
    b_ih = jax.random.uniform(k3, (4 * hidden_size,), jnp.float32, -bound, bound)
    b_hh = jax.random.uniform(k4, (4 * hidden_size,), jnp.float32, -bound, bound)
    b = (b_ih + b_hh).reshape(1, 4 * hidden_size)
    return w_ih, w_hh, b


def _pack_cell(w_ih, w_hh, b, in_size, hid_size):
    """Compact-K packed layout (128, 4*128):
        rows [0:in]          = W_ih
        rows [in:in+hid]     = W_hh
        row  in+hid          = bias (b_ih + b_hh)
      gate g occupies lanes [g*128 : g*128 + hid]; everything else is zero.
    """
    assert in_size + hid_size + 1 <= LANE, "compact-K packing needs in+hid+1 <= 128"
    W = jnp.zeros((LANE, 4 * LANE), jnp.float32)
    for g in range(4):
        col = g * LANE
        W = W.at[0:in_size, col:col + hid_size].set(
            w_ih[:, g * hid_size:(g + 1) * hid_size])
        W = W.at[in_size:in_size + hid_size, col:col + hid_size].set(
            w_hh[:, g * hid_size:(g + 1) * hid_size])
        W = W.at[in_size + hid_size, col:col + hid_size].set(
            b[0, g * hid_size:(g + 1) * hid_size])
    return W


def pack_params(raw_lay1, raw_lay2, i_size, hidden_size, num_classes):
    """Stack both cells' packed weights into one (2, 128, 512) array (one DMA)."""
    W1 = _pack_cell(*raw_lay1, in_size=i_size, hid_size=hidden_size)
    W2 = _pack_cell(*raw_lay2, in_size=hidden_size, hid_size=num_classes)
    return jnp.stack([W1, W2], axis=0)


# ---------------------------------------------------------------------------
# Forward pass (identical semantics to Wifi_fullLSTMCells2Lay.forward)
# ---------------------------------------------------------------------------

def wifi_full_lstm_cells_2lay(w_packed, x_in, h0, c0, h1, c1):
    """Returns ((hid_out, c_out), (hid_lay1, c_lay1))."""
    B, I = x_in.shape
    H = h0.shape[1]          # hidden_size of layer 1
    C = h1.shape[1]          # num_classes (hidden of layer 2)
    L = LANE

    def lane_pad(a):
        return jnp.pad(a, ((0, 0), (0, L - a.shape[1])))

    one = jnp.ones((B, 1), jnp.float32)
    # layer-0 staged contraction block: [x | h0 | 1 | zeros]
    xh0 = lane_pad(jnp.concatenate([x_in, h0, one], axis=1))
    # layer-1 staged block: [zeros_H | h1 | 1 | zeros]  (h_lay1 is added in-kernel)
    xh1 = lane_pad(jnp.concatenate([jnp.zeros((B, H), jnp.float32), h1, one],
                                   axis=1))

    # (2, B, 256): one lane-dense state operand, one block per layer
    states = jnp.stack([
        jnp.concatenate([xh0, lane_pad(c0)], axis=1),
        jnp.concatenate([xh1, lane_pad(c1)], axis=1),
    ], axis=0)

    out = pl.pallas_call(
        _lstm_layer_kernel,
        out_shape=jax.ShapeDtypeStruct((2, B, 2 * L), jnp.float32),
        grid_spec=pltpu.PrefetchScalarGridSpec(
            num_scalar_prefetch=0,
            grid=(2,),                                 # layer index: layer-2 weight
            in_specs=[                                 # DMA overlaps layer-1 compute
                pl.BlockSpec((None, B, 2 * L), lambda l: (l, 0, 0)),   # states
                pl.BlockSpec((None, L, 4 * L), lambda l: (l, 0, 0)),   # weights
            ],
            out_specs=pl.BlockSpec((None, B, 2 * L), lambda l: (l, 0, 0)),
            scratch_shapes=[pltpu.VMEM((B, L), jnp.float32)],          # h carry
        ),
        compiler_params=pltpu.CompilerParams(
            dimension_semantics=("arbitrary",)),       # layer 1 depends on layer 0
        cost_estimate=pl.CostEstimate(
            flops=2 * (2 * B * L * 4 * L),
            transcendentals=2 * 5 * B * L,
            bytes_accessed=4 * (states.size + w_packed.size + 2 * B * 2 * L)),
    )(states, w_packed)

    hid_lay1 = out[0, :, 0:H]
    c_lay1 = out[0, :, L:L + H]
    hid_out = out[1, :, 0:C]
    c_out = out[1, :, L:L + C]
    return (hid_out, c_out), (hid_lay1, c_lay1)


# ---------------------------------------------------------------------------
# Pure-JAX reference (unpadded math) for correctness check
# ---------------------------------------------------------------------------

def _reference_lstm_cell(x, h, c, w_ih, w_hh, b):
    H = h.shape[1]
    gates = x @ w_ih + h @ w_hh + b
    i_g = jax.nn.sigmoid(gates[:, 0 * H:1 * H])
    f_g = jax.nn.sigmoid(gates[:, 1 * H:2 * H])
    g_g = jnp.tanh(gates[:, 2 * H:3 * H])
    o_g = jax.nn.sigmoid(gates[:, 3 * H:4 * H])
    c_new = f_g * c + i_g * g_g
    h_new = o_g * jnp.tanh(c_new)
    return h_new, c_new


if __name__ == "__main__":
    # Small shapes consistent with the module's forward signature.
    B = 8            # batch
    I = 16           # input_size
    H = 32           # hidden_size
    C = 8            # num_classes

    key = jax.random.PRNGKey(0)
    k_p1, k_p2, kx, kh0, kc0, kh1, kc1 = jax.random.split(key, 7)

    raw1 = init_lstm_cell_params(k_p1, I, H)     # wifi_lstm_lay1
    raw2 = init_lstm_cell_params(k_p2, H, C)     # wifi_lstm_out
    w_packed = pack_params(raw1, raw2, I, H, C)  # (2, 128, 512)

    x_in = jax.random.normal(kx, (B, I), jnp.float32)
    h0 = jax.random.normal(kh0, (B, H), jnp.float32)
    c0 = jax.random.normal(kc0, (B, H), jnp.float32)
    h1 = jax.random.normal(kh1, (B, C), jnp.float32)
    c1 = jax.random.normal(kc1, (B, C), jnp.float32)

    fwd = jax.jit(wifi_full_lstm_cells_2lay)
    (hid_out, c_out), (hid_lay1, c_lay1) = fwd(w_packed, x_in, h0, c0, h1, c1)
    jax.block_until_ready((hid_out, c_out, hid_lay1, c_lay1))

    # Pure-JAX reference check (unpacked weights).
    (w_ih1, w_hh1, b1), (w_ih2, w_hh2, b2) = raw1, raw2
    ref_h1, ref_c1 = _reference_lstm_cell(x_in, h0, c0, w_ih1, w_hh1, b1)
    ref_ho, ref_co = _reference_lstm_cell(ref_h1, h1, c1, w_ih2, w_hh2, b2)

    assert jnp.allclose(hid_lay1, ref_h1, atol=1e-4, rtol=1e-4)
    assert jnp.allclose(c_lay1, ref_c1, atol=1e-4, rtol=1e-4)
    assert jnp.allclose(hid_out, ref_ho, atol=1e-4, rtol=1e-4)
    assert jnp.allclose(c_out, ref_co, atol=1e-4, rtol=1e-4)

    print("KERNEL_OK")
</pallas_src>

<mosaic_0001>
module attributes {stable_mosaic.version = 11 : i64} {
  func.func @_lstm_layer_kernel(%arg0: i32, %arg1: memref<1x8x256xf32, #tpu.memory_space<vmem>>, %arg2: memref<1x128x512xf32, #tpu.memory_space<vmem>>, %arg3: memref<1x8x256xf32, #tpu.memory_space<vmem>>, %arg4: memref<8x128xf32, #tpu.memory_space<vmem>>) attributes {dimension_semantics = [#tpu.dimension_semantics<arbitrary>], iteration_bounds = array<i64: 2>, scalar_prefetch = 0 : i64, scratch_operands = 1 : i64, tpu.core_type = #tpu.core_type<tc>, window_params = [{transform_indices = @transform_0, window_bounds = array<i64: 1, 8, 256>}, {transform_indices = @transform_1, window_bounds = array<i64: 1, 128, 512>}, {transform_indices = @transform_2, window_bounds = array<i64: 1, 8, 256>}]} {
    %c0_i32 = arith.constant 0 : i32
    %0 = arith.cmpi eq, %arg0, %c0_i32 : i32
    %1 = arith.extui %0 : i1 to i32
    %c0_i32_0 = arith.constant 0 : i32
    %2 = arith.cmpi ne, %1, %c0_i32_0 : i32
    scf.if %2 {
      %cst_20 = arith.constant 0.000000e+00 : f32
      %40 = vector.broadcast %cst_20 : f32 to vector<8x128xf32>
      %c0_21 = arith.constant 0 : index
      %c0_22 = arith.constant 0 : index
      %41 = vector.load %arg4[%c0_21, %c0_22] : memref<8x128xf32, #tpu.memory_space<vmem>>, vector<8x128xf32>
      tpu.vector_store %arg4[%c0_21, %c0_22], %40 {strides = array<i32>} : memref<8x128xf32, #tpu.memory_space<vmem>>, vector<8x128xf32>,
    } else {
    }
    %c0 = arith.constant 0 : index
    %c0_1 = arith.constant 0 : index
    %3 = vector.load %arg4[%c0, %c0_1] : memref<8x128xf32, #tpu.memory_space<vmem>>, vector<8x128xf32>
    %c0_2 = arith.constant 0 : index
    %c0_3 = arith.constant 0 : index
    %c0_4 = arith.constant 0 : index
    %4 = vector.load %arg1[%c0_2, %c0_3, %c0_4] : memref<1x8x256xf32, #tpu.memory_space<vmem>>, vector<1x8x128xf32>
    %5 = vector.shape_cast %4 : vector<1x8x128xf32> to vector<8x128xf32>
    %6 = arith.addf %3, %5 : vector<8x128xf32>
    %c0_5 = arith.constant 0 : index
    %c0_6 = arith.constant 0 : index
    %c128 = arith.constant 128 : index
    %7 = vector.load %arg1[%c0_5, %c0_6, %c128] : memref<1x8x256xf32, #tpu.memory_space<vmem>>, vector<1x8x128xf32>
    %8 = vector.shape_cast %7 : vector<1x8x128xf32> to vector<8x128xf32>
    %c0_7 = arith.constant 0 : index
    %c0_8 = arith.constant 0 : index
    %c0_9 = arith.constant 0 : index
    %9 = vector.load %arg2[%c0_7, %c0_8, %c0_9] : memref<1x128x512xf32, #tpu.memory_space<vmem>>, vector<1x128x512xf32>
    %10 = vector.shape_cast %9 : vector<1x128x512xf32> to vector<128x512xf32>
    %cst = arith.constant dense<0.000000e+00> : vector<8x512xf32>
    %11 = tpu.matmul %6, %10, %cst {dimension_numbers = #tpu.dot_dimension_numbers<[1], [0], [0], [1], [0, 0, 1, 1], [], []>} : vector<8x128xf32>, vector<128x512xf32>, vector<8x512xf32> -> vector<8x512xf32>
    %12 = vector.extract_strided_slice %11 {offsets = [0, 0], sizes = [8, 256], strides = [1, 1]} : vector<8x512xf32> to vector<8x256xf32>
    %13 = arith.negf %12 : vector<8x256xf32>
    %14 = math.exp %13 : vector<8x256xf32>
    %cst_10 = arith.constant 1.000000e+00 : f32
    %15 = vector.broadcast %cst_10 : f32 to vector<8x256xf32>
    %16 = arith.addf %15, %14 : vector<8x256xf32>
    %17 = arith.divf %15, %16 : vector<8x256xf32>
    %18 = vector.extract_strided_slice %17 {offsets = [0, 0], sizes = [8, 128], strides = [1, 1]} : vector<8x256xf32> to vector<8x128xf32>
    %19 = vector.extract_strided_slice %17 {offsets = [0, 128], sizes = [8, 128], strides = [1, 1]} : vector<8x256xf32> to vector<8x128xf32>
    %20 = vector.extract_strided_slice %11 {offsets = [0, 256], sizes = [8, 128], strides = [1, 1]} : vector<8x512xf32> to vector<8x128xf32>
    %21 = math.tanh %20 : vector<8x128xf32>
    %22 = vector.extract_strided_slice %11 {offsets = [0, 384], sizes = [8, 128], strides = [1, 1]} : vector<8x512xf32> to vector<8x128xf32>
    %23 = arith.negf %22 : vector<8x128xf32>
    %24 = math.exp %23 : vector<8x128xf32>
    %cst_11 = arith.constant 1.000000e+00 : f32
    %25 = vector.broadcast %cst_11 : f32 to vector<8x128xf32>
    %26 = arith.addf %25, %24 : vector<8x128xf32>
    %27 = arith.divf %25, %26 : vector<8x128xf32>
    %28 = arith.mulf %19, %8 : vector<8x128xf32>
    %29 = arith.mulf %18, %21 : vector<8x128xf32>
    %30 = arith.addf %28, %29 : vector<8x128xf32>
    %31 = math.tanh %30 : vector<8x128xf32>
    %32 = arith.mulf %27, %31 : vector<8x128xf32>
    %c0_12 = arith.constant 0 : index
    %c0_13 = arith.constant 0 : index
    %33 = vector.load %arg4[%c0_12, %c0_13] : memref<8x128xf32, #tpu.memory_space<vmem>>, vector<8x128xf32>
    tpu.vector_store %arg4[%c0_12, %c0_13], %32 {strides = array<i32>} : memref<8x128xf32, #tpu.memory_space<vmem>>, vector<8x128xf32>,
    %c0_14 = arith.constant 0 : index
    %c0_15 = arith.constant 0 : index
    %c0_16 = arith.constant 0 : index
    %34 = vector.load %arg3[%c0_14, %c0_15, %c0_16] : memref<1x8x256xf32, #tpu.memory_space<vmem>>, vector<1x8x128xf32>
    %35 = vector.shape_cast %34 : vector<1x8x128xf32> to vector<8x128xf32>
    %36 = vector.shape_cast %32 : vector<8x128xf32> to vector<1x8x128xf32>
    tpu.vector_store %arg3[%c0_14, %c0_15, %c0_16], %36 {strides = array<i32>} : memref<1x8x256xf32, #tpu.memory_space<vmem>>, vector<1x8x128xf32>,
    %c0_17 = arith.constant 0 : index
    %c0_18 = arith.constant 0 : index
    %c128_19 = arith.constant 128 : index
    %37 = vector.load %arg3[%c0_17, %c0_18, %c128_19] : memref<1x8x256xf32, #tpu.memory_space<vmem>>, vector<1x8x128xf32>
    %38 = vector.shape_cast %37 : vector<1x8x128xf32> to vector<8x128xf32>
    %39 = vector.shape_cast %30 : vector<8x128xf32> to vector<1x8x128xf32>
    tpu.vector_store %arg3[%c0_17, %c0_18, %c128_19], %39 {strides = array<i32>} : memref<1x8x256xf32, #tpu.memory_space<vmem>>, vector<1x8x128xf32>,
    return
  }
  func.func @transform_0(%arg0: i32) -> (i32, i32, i32) {
    %c0_i32 = arith.constant 0 : i32
    %c0_i32_0 = arith.constant 0 : i32
    %c0_i32_1 = arith.constant 0 : i32
    return %arg0, %c0_i32, %c0_i32_0 : i32, i32, i32
  }
  func.func @transform_1(%arg0: i32) -> (i32, i32, i32) {
    %c0_i32 = arith.constant 0 : i32
    %c0_i32_0 = arith.constant 0 : i32
    %c0_i32_1 = arith.constant 0 : i32
    return %arg0, %c0_i32, %c0_i32_0 : i32, i32, i32
  }
  func.func @transform_2(%arg0: i32) -> (i32, i32, i32) {
    %c0_i32 = arith.constant 0 : i32
    %c0_i32_0 = arith.constant 0 : i32
    %c0_i32_1 = arith.constant 0 : i32
    return %arg0, %c0_i32, %c0_i32_0 : i32, i32, i32
  }
}

</mosaic_0001>

<bundles_post_ra>
// kernel: wifi_full_lstm_cells_2lay.1
= control target key start
LH: loop header
LB: loop body
LE: loop exit
PB: predicated region body
PF: predicated region fallthrough
CT: control target
= control target key end

     0   :  { %7 = vsyncpa [#allocation4], 0  ;;  %s921_s0 = inlined_call_operand.vmem [shape: f32[2,8,256], index: 0, kind: input, shape index: {}]   ;;  %s922_s1 = inlined_call_operand.hbm [shape: f32[2,128,512], index: 1, kind: input, shape index: {}]   ;;  %s923_s2 = inlined_call_operand.vmem [shape: f32[2,8,256], index: 2, kind: output, shape index: {}]  }
   0x1   :  { %9 = vsyncpa [#allocation4 + $0x1], 0  ;;  %s735_s9 = smov 0   ;;  %s737_s10 = smov 0  }
   0x2   :  { %s739_s11 = smov 0   ;;  %s741_s12 = smov 0  }
   0x3 LB: > { %s754_s13 = sadd.s32 4294967295, %s713_s12   ;;  %s757_s14 = sadd.s32 1, %s713_s12   ;;  %s713_s12 = sphi %s741_s12, %s930_s12   ;;  %s709_s11 = sphi %s739_s11, %s929_s11   ;;  %s705_s10 = sphi %s737_s10, %s928_s10   ;;  %s701_s9 = sphi %s735_s9, %s927_s9  }
   0x4   : > { %s45_s15 = ssub.s32 %s713_s12, %s757_s14  ;;  %s48_s16 = sadd.s32 1, %s709_s11 }
   0x5   : > { %p46_p0 = scmp.eq.s32.totalorder %s45_s15, 0  ;;  %p55_p1 = scmp.ne.s32.totalorder %s709_s11, %s705_s10 }
   0x6   : > { %p56_p2 = scmp.eq.s32.totalorder %s713_s12, 0  ;;  %p61_p3 = scmp.ne.s32.totalorder %s705_s10, %s701_s9 }
   0x7   : > { %s767_s17 = scalar_select %p46_p0, %s709_s11, %s48_s16  }
   0x8   : > { %p57_p4 = por %p56_p2, %p55_p1  ;;  %p62_p5 = scmp.eq.s32.totalorder %s754_s13, 0 }
   0x9   : > { %p596_p6 = scmp.lt.s32.totalorder %s713_s12, 2  ;;  %s119_s19 = sand.u32 1, %s709_s11  }
   0xa   : > { %p771_p7 = por %p62_p5, %p61_p3  ;;  %s508_s20 = sshll.u32 %s119_s19, 9 }
   0xb   : > { %s523_s21 = sshll.u32 %s713_s12, 13  ;;  %s123_s25 = scalar_lea.vmem [#allocation3], %s508_s20 }
   0xc   : > { %s780_s24 = scalar_lea.hbm %s922_s1, %s523_s21  ;;  %s130_s26 = sshll.u32 %s123_s25, 4  ;;  %s782_s26 = int_to_ptr.vmem [resolvable:$true] %s130_s26 }
   0xd   : > { %p784_p8 = pnand %p596_p6, %p57_p4  ;;  %s789_s28 = scalar_lea.sflag [#allocation4], %s119_s19 }
   0xe   : > { %s649_s29 = scalar_lea.hbm %s780_s24, 8192  ;;  %s654_s4 = scalar_lea.hbm %s922_s1, 16384 }
   0xf   : > { %p650_p10 = scmp.ne.s32.totalorder %s780_s24, %s649_s29  ;;  %p651_p11 = pneg %p784_p8 }
  0x10   : > { %p655_p0 = scmp.lt.u32.totalorder %s780_s24, %s922_s1  ;;  %p656_p1 = scmp.lt.u32.totalorder %s654_s4, %s649_s29 }
  0x11   : > { %p652_p12 = pnand %p651_p11, %p650_p10  ;;  %p658_p3 = scmp.lt.u32.totalorder %s649_s29, %s780_s24 }
  0x12   : > { %p657_p2 = por %p656_p1, %p655_p0 }
  0x13   : > { %p653_p13 = pneg %p652_p12 }
  0x14   : > { %p659_p4 = por %p658_p3, %p657_p2 }
  0x16   : > { %p660_p5 = pnand %p659_p4, %p653_p13 }
  0x18   : > { %663 = shalt.err (!%p660_p5)
}
  0x19   : > { %s664_s7 = scalar_lea.vmem %s782_s26, 8192  ;;  %s715_s8 = smov [#allocation3]  }
  0x1a   : > { %p665_p6 = scmp.ne.s32.totalorder %s782_s26, %s664_s7  ;;  %s669_s9 = sshll.u32 %s715_s8, 4  ;;  %s670_s9 = int_to_ptr.vmem [resolvable:$false] %s669_s9 }
  0x1b   : > { %s671_s15 = scalar_lea.vmem %s670_s9, 16384  ;;  %p672_p9 = scmp.lt.s32.totalorder %s782_s26, %s670_s9 }
  0x1c   : > { %p667_p10 = pnand %p665_p6, %p651_p11  ;;  %p673_p0 = scmp.lt.s32.totalorder %s671_s15, %s664_s7 }
  0x1e   : > { %p668_p12 = pneg %p667_p10  ;;  %p674_p1 = por %p673_p0, %p672_p9 }
  0x20   : > { %p675_p2 = pnand %p674_p1, %p668_p12 }
  0x22   : > { %678 = shalt.err (!%p675_p2)
}
  0x23   : > { %s716_s16 = smov 512   ;;  %s717_s19 = smov 32  }
  0x24   : > { %595 = dma.hbm_to_vmem [thread:$0]  (!%p784_p8), %s780_s24, 8192, %s782_s26, %s789_s28, %s716_s16, %s716_s16, %s717_s19  }
  0x25   : > { %p138_p11 = scmp.lt.s32.totalorder %s713_s12, 3  ;;  %p926_p13 = scmp.ge.s32.totalorder %s713_s12, 1 }
  0x27   : > { %p139_p3 = pnand %p926_p13, %p138_p11 }
  0x28   : > { %s144_s20 = sand.u32 (!%p139_p3), 1, %s705_s10  }
  0x29   : > { %142 = sbr.rel (%p139_p3) target bundleno = 352 (0x160), region = 28  ;;  %s512_s21 = sshll.u32 (!%p139_p3), %s144_s20, 9 }
  0x2a   : > { %s145_s22 = scalar_lea.sflag (!%p139_p3), [#allocation4], %s144_s20  ;;  %s821_s23 = scalar_lea.vmem (!%p139_p3), [#allocation3], %s512_s21 }
  0x30   : > { %696 = dma.done.wait (%p771_p7), %s145_s22, 8192  }
  0x31   : > { %698 = vsyncadd (%p771_p7), %s145_s22, 4294959104  ;;  %p174_p9 = scmp.lt.s32.totalorder %s754_s13, 1  ;;  %p517_p8 = scmp.ne.s32.totalorder %s754_s13, 0 }
  0x32   : > { %v718_v0 = vmov (!%p517_p8), 0.0  }
  0x33   : > { %s175_s24 = scalar_select %p174_p9, %s754_s13, 1 }
  0x34   : > { %187 = sbr.rel (%p517_p8) target bundleno = 59 (0x3b), region = 36  ;;  %188 = vst [vmem:[#allocation2] sm:$0xff] (!%p517_p8), %v718_v0 }
  0x35   : > { %s524_s25 = sshll.u32 %s175_s24, 4 }
  0x36   : > { %s832_s27 = scalar_lea.vmem %s921_s0, %s524_s25  ;;  %s837_s30 = scalar_lea.vmem %s923_s2, %s524_s25 }
  0x3b PF: > { %v194_v1 = vld [vmem:[%s821_s23 + $0x8] sm:$0xff]  ;;  %v193_v3 = vld [vmem:[%s821_s23] sm:$0xff]  ;;  %v719_v8 = vmov 0.0   ;;  %v196_v20 = vld [vmem:[%s821_s23 + $0x18] sm:$0xff] }
  0x3c   : > { %v198_v2 = vld [vmem:[%s821_s23 + $0x28] sm:$0xff]  ;;  %v197_v5 = vld [vmem:[%s821_s23 + $0x20] sm:$0xff]  ;;  %321 = vmatprep.mubr.f32.mxu0 %v719_v8  ;;  %392 = vmatprep.mubr.f32.mxu1 %v719_v8  ;;  %v200_v21 = vld [vmem:[%s821_s23 + $0x38] sm:$0xff] }
  0x3d   : > { %v526_v4 = vpack.c.bf16 %v198_v2, %v194_v1  ;;  %v202_v6 = vld [vmem:[%s821_s23 + $0x48] sm:$0xff]  ;;  %v528_v9 = vpack.c.bf16 %v197_v5, %v193_v3  ;;  %v201_v11 = vld [vmem:[%s821_s23 + $0x40] sm:$0xff]  ;;  %v558_v23 = vpack.c.bf16 %v200_v21, %v196_v20  ;;  %v195_v24 = vld [vmem:[%s821_s23 + $0x10] sm:$0xff] }
  0x3e   : > { %v206_v7 = vld [vmem:[%s821_s23 + $0x68] sm:$0xff]  ;;  %v205_v12 = vld [vmem:[%s821_s23 + $0x60] sm:$0xff]  ;;  %v199_v25 = vld [vmem:[%s821_s23 + $0x30] sm:$0xff] }
  0x3f   : > { %v530_v10 = vpack.c.bf16 %v206_v7, %v202_v6  ;;  %v210_v13 = vld [vmem:[%s821_s23 + $0x88] sm:$0xff]  ;;  %527 = vmatprep.subr.bf16.mxu0 %v526_v4  ;;  %v532_v15 = vpack.c.bf16 %v205_v12, %v201_v11  ;;  %v209_v16 = vld [vmem:[%s821_s23 + $0x80] sm:$0xff]  ;;  %v560_v26 = vpack.c.bf16 %v199_v25, %v195_v24  ;;  %559 = vmatprep.subr.bf16.mxu1 %v558_v23  ;;  %v204_v28 = vld [vmem:[%s821_s23 + $0x58] sm:$0xff] }
  0x40   : > { %v214_v14 = vld [vmem:[%s821_s23 + $0xa8] sm:$0xff]  ;;  %529 = vmatpush1.bf16.msra.mxu0 %v528_v9  ;;  %v213_v17 = vld [vmem:[%s821_s23 + $0xa0] sm:$0xff]  ;;  %v208_v29 = vld [vmem:[%s821_s23 + $0x78] sm:$0xff] }
  0x41   : > { %531 = vmatprep.subr.bf16.mxu0 %v530_v10  ;;  %v534_v18 = vpack.c.bf16 %v214_v14, %v210_v13  ;;  %v218_v19 = vld [vmem:[%s821_s23 + $0xc8] sm:$0xff]  ;;  %v536_v27 = vpack.c.bf16 %v213_v17, %v209_v16  ;;  %v203_v30 = vld [vmem:[%s821_s23 + $0x50] sm:$0xff]  ;;  %v217_v32 = vld [vmem:[%s821_s23 + $0xc0] sm:$0xff]  ;;  %561 = vmatpush1.bf16.msra.mxu1 %v560_v26  ;;  %v562_v34 = vpack.c.bf16 %v208_v29, %v204_v28 }
  0x42   : > { %v222_v22 = vld [vmem:[%s821_s23 + $0xe8] sm:$0xff]  ;;  %v221_v33 = vld [vmem:[%s821_s23 + $0xe0] sm:$0xff]  ;;  %v207_v35 = vld [vmem:[%s821_s23 + $0x70] sm:$0xff] }
  0x43   : > { %v538_v31 = vpack.c.bf16 %v222_v22, %v218_v19  ;;  %v226_v36 = vld [vmem:[%s821_s23 + $0x108] sm:$0xff]  ;;  %v564_v38 = vpack.c.bf16 %v207_v35, %v203_v30  ;;  %v212_v39 = vld [vmem:[%s821_s23 + $0x98] sm:$0xff]  ;;  %563 = vmatprep.subr.bf16.mxu1 %v562_v34  ;;  %v211_v41 = vld [vmem:[%s821_s23 + $0x90] sm:$0xff]  ;;  %v540_v43 = vpack.c.bf16 %v221_v33, %v217_v32 }
  0x44   : > { %533 = vmatpush1.bf16.msra.mxu0 %v532_v15  ;;  %v230_v37 = vld [vmem:[%s821_s23 + $0x128] sm:$0xff]  ;;  %v216_v40 = vld [vmem:[%s821_s23 + $0xb8] sm:$0xff]  ;;  %v215_v42 = vld [vmem:[%s821_s23 + $0xb0] sm:$0xff] }
  0x45   : > { %535 = vmatprep.subr.bf16.mxu0 %v534_v18  ;;  %v225_v44 = vld [vmem:[%s821_s23 + $0x100] sm:$0xff]  ;;  %v566_v46 = vpack.c.bf16 %v216_v40, %v212_v39  ;;  %v542_v47 = vpack.c.bf16 %v230_v37, %v226_v36  ;;  %565 = vmatpush1.bf16.msra.mxu1 %v564_v38  ;;  %v234_v48 = vld [vmem:[%s821_s23 + $0x148] sm:$0xff]  ;;  %v568_v49 = vpack.c.bf16 %v215_v42, %v211_v41  ;;  %v220_v50 = vld [vmem:[%s821_s23 + $0xd8] sm:$0xff] }
  0x46   : > { %v229_v45 = vld [vmem:[%s821_s23 + $0x120] sm:$0xff]  ;;  %v224_v51 = vld [vmem:[%s821_s23 + $0xf8] sm:$0xff]  ;;  %v238_v52 = vld [vmem:[%s821_s23 + $0x168] sm:$0xff] }
  0x47   : > { %567 = vmatprep.subr.bf16.mxu1 %v566_v46  ;;  %v570_v53 = vpack.c.bf16 %v224_v51, %v220_v50  ;;  %v219_v54 = vld [vmem:[%s821_s23 + $0xd0] sm:$0xff]  ;;  %v544_v56 = vpack.c.bf16 %v229_v45, %v225_v44  ;;  %v228_v57 = vld [vmem:[%s821_s23 + $0x118] sm:$0xff]  ;;  %v546_v59 = vpack.c.bf16 %v238_v52, %v234_v48  ;;  %v233_v60 = vld [vmem:[%s821_s23 + $0x140] sm:$0xff] }
  0x48   : > { %537 = vmatpush1.bf16.msra.mxu0 %v536_v27  ;;  %v223_v55 = vld [vmem:[%s821_s23 + $0xf0] sm:$0xff]  ;;  %v232_v58 = vld [vmem:[%s821_s23 + $0x138] sm:$0xff]  ;;  %v237_v61 = vld [vmem:[%s821_s23 + $0x160] sm:$0xff] }
  0x49   : > { %539 = vmatprep.subr.bf16.mxu0 %v538_v31  ;;  %569 = vmatpush1.bf16.msra.mxu1 %v568_v49  ;;  %v242_v62 = vld [vmem:[%s821_s23 + $0x188] sm:$0xff]  ;;  %v572_v63 = vpack.c.bf16 %v223_v55, %v219_v54  ;;  %v574_v1 = vpack.c.bf16 %v232_v58, %v228_v57  ;;  %v227_v2 = vld [vmem:[%s821_s23 + $0x110] sm:$0xff]  ;;  %v236_v4 = vld [vmem:[%s821_s23 + $0x158] sm:$0xff]  ;;  %v548_v6 = vpack.c.bf16 %v237_v61, %v233_v60 }
  0x4a   : > { %v246_v0 = vld [vmem:[%s821_s23 + $0x1a8] sm:$0xff]  ;;  %571 = vmatprep.subr.bf16.mxu1 %v570_v53  ;;  %v231_v3 = vld [vmem:[%s821_s23 + $0x130] sm:$0xff]  ;;  %v240_v5 = vld [vmem:[%s821_s23 + $0x178] sm:$0xff] }
  0x4b   : > { %v550_v7 = vpack.c.bf16 %v246_v0, %v242_v62  ;;  %v241_v8 = vld [vmem:[%s821_s23 + $0x180] sm:$0xff]  ;;  %v250_v10 = vld [vmem:[%s821_s23 + $0x1c8] sm:$0xff]  ;;  %v576_v11 = vpack.c.bf16 %v231_v3, %v227_v2  ;;  %v578_v13 = vpack.c.bf16 %v240_v5, %v236_v4  ;;  %v235_v14 = vld [vmem:[%s821_s23 + $0x150] sm:$0xff] }
  0x4c   : > { %541 = vmatpush1.bf16.msra.mxu0 %v540_v43  ;;  %v245_v9 = vld [vmem:[%s821_s23 + $0x1a0] sm:$0xff]  ;;  %v254_v12 = vld [vmem:[%s821_s23 + $0x1e8] sm:$0xff]  ;;  %v239_v15 = vld [vmem:[%s821_s23 + $0x170] sm:$0xff] }
  0x4d   : > { %543 = vmatprep.subr.bf16.mxu0 %v542_v47  ;;  %573 = vmatpush1.bf16.msra.mxu1 %v572_v63  ;;  %v244_v16 = vld [vmem:[%s821_s23 + $0x198] sm:$0xff]  ;;  %v552_v18 = vpack.c.bf16 %v245_v9, %v241_v8  ;;  %v554_v19 = vpack.c.bf16 %v254_v12, %v250_v10  ;;  %v249_v20 = vld [vmem:[%s821_s23 + $0x1c0] sm:$0xff]  ;;  %v580_v22 = vpack.c.bf16 %v239_v15, %v235_v14  ;;  %v243_v24 = vld [vmem:[%s821_s23 + $0x190] sm:$0xff] }
  0x4e   : > { %575 = vmatprep.subr.bf16.mxu1 %v574_v1  ;;  %v248_v17 = vld [vmem:[%s821_s23 + $0x1b8] sm:$0xff]  ;;  %v253_v21 = vld [vmem:[%s821_s23 + $0x1e0] sm:$0xff]  ;;  %v247_v25 = vld [vmem:[%s821_s23 + $0x1b0] sm:$0xff] }
  0x4f   : > { %v582_v23 = vpack.c.bf16 %v248_v17, %v244_v16  ;;  %v252_v26 = vld [vmem:[%s821_s23 + $0x1d8] sm:$0xff]  ;;  %v556_v28 = vpack.c.bf16 %v253_v21, %v249_v20  ;;  %v584_v31 = vpack.c.bf16 %v247_v25, %v243_v24  ;;  %v251_v33 = vld [vmem:[%s821_s23 + $0x1d0] sm:$0xff]  ;;  %v192_v50 = vld [vmem:[%s832_s27 + $0x8] sm:$0xff] }
  0x50   : > { %545 = vmatpush1.bf16.msra.mxu0 %v544_v56  ;;  %v256_v27 = vld [vmem:[%s821_s23 + $0x1f8] sm:$0xff]  ;;  %v255_v34 = vld [vmem:[%s821_s23 + $0x1f0] sm:$0xff] }
  0x51   : > { %547 = vmatprep.subr.bf16.mxu0 %v546_v59  ;;  %577 = vmatpush1.bf16.msra.mxu1 %v576_v11  ;;  %v189_v29 = vld [vmem:[#allocation2] sm:$0xff]  ;;  %v586_v32 = vpack.c.bf16 %v256_v27, %v252_v26  ;;  %v588_v36 = vpack.c.bf16 %v255_v34, %v251_v33 }
  0x52   : > { %579 = vmatprep.subr.bf16.mxu1 %v578_v13  ;;  %v190_v30 = vld [vmem:[%s832_s27] sm:$0xff] }
  0x53   : > { %v191_v35 = vadd.f32 %v190_v30, %v189_v29 }
  0x54   : > { %549 = vmatpush1.bf16.msra.mxu0 %v548_v6 }
  0x55   : > { %551 = vmatprep.subr.bf16.mxu0 %v550_v7  ;;  %581 = vmatpush1.bf16.msra.mxu1 %v580_v22 }
  0x56   : > { %583 = vmatprep.subr.bf16.mxu1 %v582_v23 }
  0x58   : > { %553 = vmatpush1.bf16.msra.mxu0 %v552_v18 }
  0x59   : > { %555 = vmatprep.subr.bf16.mxu0 %v554_v19  ;;  %585 = vmatpush1.bf16.msra.mxu1 %v584_v31 }
  0x5a   : > { %587 = vmatprep.subr.bf16.mxu1 %v586_v32 }
  0x5c   : > { %557 = vmatpush1.bf16.msra.mxu0 %v556_v28 }
  0x5d   : > { %589 = vmatpush1.bf16.msra.mxu1 %v588_v36 }
  0x5f   : > { %322 = vmatmul.mubr.f32.vlgmr.msra.gmra.mrb[0].mxu0 %v191_v35 }
  0x60   : > { %393 = vmatmul.mubr.f32.vlgmr.msra.gmra.mrb[0].mxu1 %v191_v35 }
 0x132   : > { %v323_v37 = vpop.f32.mrb[0].mxu0 }
 0x133   : > { %v518_v38 = vmul.f32 -1.442695, %v323_v37  ;;  %v325_v39 = vpop.f32.mrb[1].mxu0  ;;  %v394_v41 = vpop.f32.mrb[0].mxu1 }
 0x134   : > { %v519_v40 = vmul.f32 -1.442695, %v325_v39  ;;  %v396_v42 = vpop.f32.mrb[1].mxu1 }
 0x135   : > { %633 = vpow2.f32 %v518_v38  ;;  %v520_v43 = vmul.f32 -1.442695, %v396_v42 }
 0x136   : > { %635 = vpow2.f32 %v519_v40 }
 0x137   : > { %637 = vpow2.f32 %v520_v43 }
 0x138   : > { %639 = vtanh.f32 %v394_v41 }
 0x13f   : > { %v634_v44 = vpop.eup %633 }
 0x140   : > { %v636_v45 = vpop.eup %635  ;;  %v405_v46 = vadd.f32 1.0, %v634_v44 }
 0x141   : > { %v406_v47 = vadd.f32 1.0, %v636_v45  ;;  %v638_v48 = vpop.eup %637 }
 0x142   : > { %641 = vrcp.f32 %v405_v46  ;;  %v640_v49 = vpop.eup %639  ;;  %v415_v52 = vadd.f32 1.0, %v638_v48 }
 0x143   : > { %643 = vrcp.f32 %v406_v47 }
 0x144   : > { %645 = vrcp.f32 %v415_v52 }
 0x14c   : > { %v642_v51 = vpop.eup %641 }
 0x14d   : > { %v644_v53 = vpop.eup %643  ;;  %v419_v54 = vmul.f32 %v642_v51, %v640_v49 }
 0x14e   : > { %v418_v55 = vmul.f32 %v644_v53, %v192_v50  ;;  %v646_v57 = vpop.eup %645 }
 0x150   : > { %v420_v56 = vadd.f32 %v419_v54, %v418_v55 }
 0x152   : > { %647 = vtanh.f32 %v420_v56  ;;  %425 = vst [vmem:[%s837_s30 + $0x8] sm:$0xff] %v420_v56 }
 0x15c   : > { %v648_v58 = vpop.eup %647 }
 0x15d   : > { %v422_v59 = vmul.f32 %v648_v58, %v646_v57 }
 0x15f   : > { %423 = vst [vmem:[#allocation2] sm:$0xff] %v422_v59  ;;  %424 = vst [vmem:[%s837_s30] sm:$0xff] %v422_v59 }
 0x160 PF: > { %p12_p7 = scmp.ge.s32.totalorder %s757_s14, 4   ;;  %s927_s9 = smov %s705_s10 }
 0x161   : > { %s928_s10 = smov %s709_s11  ;;  %s929_s11 = smov %s767_s17 }
 0x162   : > { %s930_s12 = smov %s757_s14  ;;  %14 = sbr.rel (!%p12_p7) target bundleno = 3 (0x3), region = 75 }
 0x169   :  { %447 = vsyncpa [#allocation4], 1 }
 0x16a   :  { %449 = vsyncpa [#allocation4 + $0x1], 1 }

</bundles_post_ra>
